<compile_context>
chip_gen: v5e
topology: v5e:2x2
jax: 0.10.0
libtpu: 0.0.40
codegen_flags: <defaults>
</compile_context>

<pallas_src>
import math

import jax
import jax.numpy as jnp
from jax.experimental import pallas as pl
from jax.experimental.pallas import tpu as pltpu

_LANES = 128
_TILE_BYTES = 2 * 1024 * 1024       # per-buffer VMEM tile target (safe on v5e/v6e/v7x)
_MIN_PALLAS_BYTES = 256 * 1024      # below this, plain XLA multiply is faster


def _drop_path_kernel(scale_ref, keep_ref, x_ref, o_ref):
    # scale_ref: SMEM (B,) f32 ; keep_ref: SMEM (B,) i32 (used only by index_maps)
    # x_ref / o_ref: VMEM (1, tile_rows, 128)
    del keep_ref
    b = pl.program_id(0)
    s = scale_ref[b]                                   # per-sample scalar
    o_ref[...] = (x_ref[...] * s).astype(o_ref.dtype)


def drop_path_forward(x, drop_prob, training, key, use_pallas=None):
    """Pallas DropPath forward.  x: any shape with a leading batch dim."""
    if drop_prob == 0.0 or not training:
        return x

    keep_prob = 1.0 - float(drop_prob)
    B = x.shape[0]
    L = math.prod(x.shape[1:]) if x.ndim > 1 else 1

    # Per-sample binary mask, identical math to the PyTorch reference.
    u = jax.random.uniform(key, (B,), dtype=jnp.float32)
    mask = jnp.floor(keep_prob + u)                    # {0., 1.}
    if keep_prob > 0.0:
        scale = (mask / keep_prob).astype(jnp.float32)
    else:                                              # drop_prob >= 1: drop everything, no NaN
        scale = jnp.zeros_like(mask)
    keep = (mask > 0.0).astype(jnp.int32)

    total_bytes = B * L * jnp.dtype(x.dtype).itemsize
    if use_pallas is None:
        use_pallas = total_bytes >= _MIN_PALLAS_BYTES
    if not use_pallas:
        bshape = (B,) + (1,) * (x.ndim - 1)
        return (x * scale.reshape(bshape)).astype(x.dtype)

    itemsize = jnp.dtype(x.dtype).itemsize
    sublane = 8 * max(1, 4 // itemsize)                # 8 f32 / 16 bf16 / 32 int8
    max_tile_rows = max(sublane,
                        (_TILE_BYTES // (_LANES * itemsize)) // sublane * sublane)

    rows = pl.cdiv(L, _LANES)
    l_pad = rows * _LANES

    x_flat = x.reshape(B, L)
    padded = l_pad != L
    if padded:
        # TODO(synk): mask the ragged lane edge in-kernel instead of this extra HBM copy.
        x_flat = jnp.pad(x_flat, ((0, 0), (0, l_pad - L)))
    x3 = x_flat.reshape(B, rows, _LANES)

    if rows <= max_tile_rows:
        tile_rows = rows          # full extent: always legal, zero row padding
    else:
        tile_rows = max_tile_rows  # sublane-aligned; Pallas masks the ragged last block
    row_blocks = pl.cdiv(rows, tile_rows)
    grid = (B, row_blocks)

    # Dropped samples map their input block to (0,0,0): consecutive identical block
    # indices suppress the re-DMA, so their HBM read traffic is (mostly) skipped.
    def x_index_map(b, r, scale_ref, keep_ref):
        k = keep_ref[b]
        return (b * k, r * k, 0)

    def o_index_map(b, r, scale_ref, keep_ref):
        return (b, r, 0)

    bytes_io = 2 * B * rows * _LANES * itemsize

    out3 = pl.pallas_call(
        _drop_path_kernel,
        out_shape=jax.ShapeDtypeStruct((B, rows, _LANES), x.dtype),
        grid_spec=pltpu.PrefetchScalarGridSpec(
            num_scalar_prefetch=2,
            grid=grid,
            in_specs=[pl.BlockSpec((1, tile_rows, _LANES), x_index_map)],
            out_specs=pl.BlockSpec((1, tile_rows, _LANES), o_index_map),
        ),
        compiler_params=pltpu.CompilerParams(
            dimension_semantics=("parallel", "parallel")),
        cost_estimate=pl.CostEstimate(
            flops=B * rows * _LANES,
            transcendentals=0,
            bytes_accessed=bytes_io),
    )(scale, keep, x3)

    if padded:
        return out3.reshape(B, l_pad)[:, :L].reshape(x.shape)
    return out3.reshape(x.shape)


def _reference(x, drop_prob, key):
    keep_prob = 1.0 - float(drop_prob)
    B = x.shape[0]
    u = jax.random.uniform(key, (B,), dtype=jnp.float32)
    mask = jnp.floor(keep_prob + u)
    scale = jnp.where(keep_prob > 0.0, mask / max(keep_prob, 1e-30), 0.0)
    bshape = (B,) + (1,) * (x.ndim - 1)
    return (x * scale.reshape(bshape)).astype(x.dtype)


if __name__ == "__main__":
    key = jax.random.PRNGKey(0)
    kx, kmask, kx2 = jax.random.split(key, 3)

    # Small transformer-token shape: batch=2, seq=8, hidden=32 (L=256 -> 2 rows of 128).
    B, N, D = 2, 8, 32
    drop_prob = 0.5
    x = jax.random.normal(kx, (B, N, D), dtype=jnp.float32)

    out = drop_path_forward(x, drop_prob, training=True, key=kmask, use_pallas=True)
    jax.block_until_ready(out)
    ref = _reference(x, drop_prob, kmask)
    assert out.shape == x.shape
    assert jnp.allclose(out, ref, atol=1e-6, rtol=1e-6)

    # Auto path (fallback for tiny inputs) must match the kernel path.
    out_auto = drop_path_forward(x, drop_prob, training=True, key=kmask)
    assert jnp.allclose(out_auto, ref, atol=1e-6, rtol=1e-6)

    # bf16 path through the kernel (dtype-aware tiling; 16 rows of 128 lanes).
    xb = jax.random.normal(kx2, (2, 16, 128), dtype=jnp.bfloat16)
    outb = drop_path_forward(xb, 0.25, training=True, key=kmask, use_pallas=True)
    jax.block_until_ready(outb)
    refb = _reference(xb, 0.25, kmask)
    assert jnp.allclose(outb.astype(jnp.float32), refb.astype(jnp.float32),
                        atol=1e-2, rtol=1e-2)

    # Inference / drop_prob==0 are identity; drop_prob==1 drops everything (no NaN).
    assert jnp.array_equal(drop_path_forward(x, 0.0, True, kmask), x)
    assert jnp.array_equal(drop_path_forward(x, drop_prob, False, kmask), x)
    out1 = drop_path_forward(x, 1.0, True, kmask, use_pallas=True)
    assert jnp.array_equal(out1, jnp.zeros_like(x))

    print("KERNEL_OK")
</pallas_src>

<mosaic_0001>
module attributes {stable_mosaic.version = 11 : i64} {
  func.func @_drop_path_kernel(%arg0: i32, %arg1: i32, %arg2: memref<2xf32, #tpu.memory_space<smem>>, %arg3: memref<2xi32, #tpu.memory_space<smem>>, %arg4: memref<1x2x128xf32, #tpu.memory_space<vmem>>, %arg5: memref<1x2x128xf32, #tpu.memory_space<vmem>>) attributes {dimension_semantics = [#tpu.dimension_semantics<parallel>, #tpu.dimension_semantics<parallel>], iteration_bounds = array<i64: 2, 1>, scalar_prefetch = 2 : i64, scratch_operands = 0 : i64, tpu.core_type = #tpu.core_type<tc>, window_params = [{transform_indices = @transform_0, window_bounds = array<i64: 1, 2, 128>}, {transform_indices = @transform_1, window_bounds = array<i64: 1, 2, 128>}]} {
    %0 = arith.index_cast %arg0 : i32 to index
    %1 = memref.load %arg2[%0] : memref<2xf32, #tpu.memory_space<smem>>
    %c0 = arith.constant 0 : index
    %c0_0 = arith.constant 0 : index
    %c0_1 = arith.constant 0 : index
    %2 = vector.load %arg4[%c0, %c0_0, %c0_1] : memref<1x2x128xf32, #tpu.memory_space<vmem>>, vector<1x2x128xf32>
    %3 = vector.broadcast %1 : f32 to vector<1x2x128xf32>
    %4 = arith.mulf %2, %3 : vector<1x2x128xf32>
    %c0_2 = arith.constant 0 : index
    %c0_3 = arith.constant 0 : index
    %c0_4 = arith.constant 0 : index
    %5 = vector.load %arg5[%c0_2, %c0_3, %c0_4] : memref<1x2x128xf32, #tpu.memory_space<vmem>>, vector<1x2x128xf32>
    tpu.vector_store %arg5[%c0_2, %c0_3, %c0_4], %4 {strides = array<i32>} : memref<1x2x128xf32, #tpu.memory_space<vmem>>, vector<1x2x128xf32>,
    return
  }
  func.func @transform_0(%arg0: i32, %arg1: i32, %arg2: memref<2xf32, #tpu.memory_space<smem>>, %arg3: memref<2xi32, #tpu.memory_space<smem>>) -> (i32, i32, i32) {
    %0 = arith.index_cast %arg0 : i32 to index
    %1 = memref.load %arg3[%0] : memref<2xi32, #tpu.memory_space<smem>>
    %2 = arith.muli %arg0, %1 : i32
    %3 = arith.muli %arg1, %1 : i32
    %c0_i32 = arith.constant 0 : i32
    %c0_i32_0 = arith.constant 0 : i32
    return %2, %3, %c0_i32 : i32, i32, i32
  }
  func.func @transform_1(%arg0: i32, %arg1: i32, %arg2: memref<2xf32, #tpu.memory_space<smem>>, %arg3: memref<2xi32, #tpu.memory_space<smem>>) -> (i32, i32, i32) {
    %c0_i32 = arith.constant 0 : i32
    %c0_i32_0 = arith.constant 0 : i32
    return %arg0, %arg1, %c0_i32 : i32, i32, i32
  }
}

</mosaic_0001>

<bundles_post_ra>
// kernel: tpu_custom_call.1
= control target key start
LH: loop header
LB: loop body
LE: loop exit
PB: predicated region body
PF: predicated region fallthrough
CT: control target
= control target key end

     0   :  { %s549_s18 = smov [#allocation3]   ;;  %s550_s19 = smov [#allocation4]   ;;  %s747_s0 = inlined_call_operand.hbm [shape: f32[2], index: 0, kind: input, shape index: {}]   ;;  %s748_s2 = inlined_call_operand.hbm [shape: f32[2,2,128], index: 2, kind: input, shape index: {}]   ;;  %s749_s3 = inlined_call_operand.hbm [shape: f32[2,2,128], index: 3, kind: output, shape index: {}]   ;;  %s750_s1 = inlined_call_operand.hbm [shape: s32[2], index: 1, kind: input, shape index: {}]  }
   0x1   :  { %s9_s14 = sshll.u32 %s747_s0, 4  ;;  %s14_s17 = sshll.u32 %s750_s1, 4  ;;  %s10_s14 = int_to_ptr.hbm [resolvable:$true] %s9_s14  ;;  %s15_s17 = int_to_ptr.hbm [resolvable:$true] %s14_s17 }
   0x2   :  { %12 = dma.hbm_to_smem %s10_s14, 16, %s549_s18, [#allocation2] }
   0x3   :  { %17 = dma.hbm_to_smem %s15_s17, 16, %s550_s19, [#allocation2] }
   0x4   :  { %503 = dma.done.wait [#allocation2], 32 }
   0x5   :  { %504 = vsyncadd [#allocation2], 4294967264 }
   0x6   :  { %20 = sfence }
   0x7   :  { %21 = vsyncpa [#allocation6], 0 }
   0x8   :  { %23 = vsyncpa [#allocation6 + $0x1], 0 }
   0x9   :  { %24 = vsyncpa [#allocation7], 0 }
   0xa   :  { %26 = vsyncpa [#allocation7 + $0x1], 0  ;;  %s577_s20 = smov 0   ;;  %s579_s0 = smov 0  }
   0xb   :  { %s581_s21 = smov 0   ;;  %s583_s1 = smov 0  }
   0xc   :  { %s585_s22 = smov 0   ;;  %s587_s23 = smov 0  }
   0xd   :  { %s589_s24 = smov 0   ;;  %s591_s25 = smov 0  }
   0xe   :  { %s593_s26 = smov 0  }
   0xf LB: > { %s280_s27 = sadd.s32 4294967295, %s547_s26   ;;  %s44_s28 = sadd.s32 1, %s543_s25  ;;  %s547_s26 = sphi %s593_s26, %s32_s26   ;;  %s543_s25 = sphi %s591_s25, %s768_s25   ;;  %s539_s24 = sphi %s589_s24, %s767_s24   ;;  %s535_s23 = sphi %s587_s23, %s766_s23   ;;  %s531_s22 = sphi %s585_s22, %s765_s22   ;;  %s527_s1 = sphi %s583_s1, %s764_s1   ;;  %s523_s21 = sphi %s581_s21, %s763_s21   ;;  %s519_s0 = sphi %s579_s0, %s762_s0   ;;  %s515_s20 = sphi %s577_s20, %s761_s20  }
  0x10   : > { %s48_s29 = sld [smem:[#allocation4 + %s543_s25]]  ;;  %s281_s30 = sadd.s32 4294967294, %s547_s26  }
  0x11   : > { %p46_p0 = scmp.ge.s32.totalorder %s44_s28, 2  ;;  %s59_s4 = sadd.s32 1, %s535_s23 }
  0x12   : > { %p66_p1 = scmp.ne.s32.totalorder %s535_s23, %s531_s22  ;;  %p67_p2 = scmp.eq.s32.totalorder %s547_s26, 0 }
  0x13   : > { %s770_s28 = smov (%p46_p0, %s44_s28), 0  ;;  %p72_p3 = scmp.ne.s32.totalorder %s531_s22, %s527_s1 }
  0x14   : > { %752 = sst [smem:[#allocation14_spill]] %s770_s28  ;;  %p73_p4 = scmp.eq.s32.totalorder %s280_s27, 0 }
  0x15   : > { %s51_s5 = sld [smem:[#allocation4 + %s770_s28]]  ;;  %s82_s7 = ssub.s32 %s543_s25, %s770_s28 }
  0x16   : > { %s49_s6 = smul.u32 %s543_s25, %s48_s29  ;;  %p635_p5 = por %p73_p4, %p72_p3 }
  0x17   : > { %p85_p6 = scmp.eq.s32.totalorder %s82_s7, 0  ;;  %s87_s9 = sadd.s32 1, %s523_s21 }
  0x18   : > { %p97_p7 = scmp.ne.s32.totalorder %s523_s21, %s519_s0  ;;  %p98_p8 = scmp.eq.s32.totalorder %s280_s27, 1 }
  0x19   : > { %s643_s10 = scalar_select %p85_p6, %s523_s21, %s87_s9  }
  0x1a   : > { %p103_p9 = scmp.ne.s32.totalorder %s519_s0, %s515_s20  ;;  %p104_p10 = scmp.eq.s32.totalorder %s281_s30, 1 }
  0x1b   : > { %s52_s11 = smul.u32 %s51_s5, %s770_s28  ;;  %p648_p11 = por %p98_p8, %p97_p7 }
  0x1c   : > { %p283_p12 = scmp.ge.s32.totalorder %s547_s26, 2  ;;  %p653_p13 = por %p104_p10, %p103_p9 }
  0x1d   : > { %s54_s13 = ssub.s32 %s49_s6, %s52_s11  ;;  %p68_p3 = por %p67_p2, %p66_p1 }
  0x1e   : > { %p57_p0 = scmp.eq.s32.totalorder %s54_s13, 0  ;;  %p309_p4 = scmp.lt.s32.totalorder %s547_s26, 2 }
  0x1f   : > { %s124_s16 = sand.u32 1, %s535_s23   ;;  %p286_p7 = scmp.ge.s32.totalorder %s547_s26, 1 }
  0x20   : > { %s664_s15 = scalar_select %p57_p0, %s535_s23, %s59_s4  }
  0x21   : > { %p667_p6 = pnand %p309_p4, %p68_p3  ;;  %s284_s1 = sshll.u32 %s124_s16, 1 }
  0x22   : > { %756 = sst [smem:[#allocation15_spill]] %s664_s15  ;;  %p145_p8 = scmp.lt.s32.totalorder %s547_s26, 3 }
  0x23   : > { %s293_s18 = scalar_select %p68_p3, [#allocation4], [#allocation9] }
  0x24   : > { %s294_s19 = scalar_select %p68_p3, %s543_s25, 0 }
  0x25   : > { %s772_s18 = smov (!%p309_p4, %s293_s18), [#allocation10]  ;;  %p674_p9 = pnand %p286_p7, %p145_p8 }
  0x26   : > { %s774_s19 = smov (!%p309_p4, %s294_s19), 0  ;;  %s128_s4 = scalar_lea.vmem [#allocation5], %s284_s1 }
  0x27   : > { %s129_s27 = sld [smem:[%s772_s18 + %s774_s19]]  ;;  %s140_s5 = sshll.u32 %s128_s4, 4  ;;  %s141_s5 = int_to_ptr.vmem [resolvable:$true] %s140_s5 }
  0x28   : > { %s125_s28 = scalar_lea.sflag [#allocation6], %s124_s16  ;;  %p413_p2 = pneg %p667_p6 }
  0x2d   : > { %s130_s30 = smul.u32 %s543_s25, %s129_s27  ;;  %s416_s27 = scalar_lea.hbm %s748_s2, 4 }
  0x2f   : > { %s285_s6 = sshll.u32 %s130_s30, 1 }
  0x30   : > { %s136_s11 = scalar_lea.hbm %s748_s2, %s285_s6 }
  0x31   : > { %s138_s13 = sshll.u32 %s136_s11, 4  ;;  %s139_s13 = int_to_ptr.hbm [resolvable:$true] %s138_s13 }
  0x32   : > { %s409_s15 = sshra.s32 %s139_s13, 4  ;;  %s410_s15 = int_to_ptr.hbm [resolvable:$true] %s409_s15 }
  0x33   : > { %s411_s18 = scalar_lea.hbm %s410_s15, 2  ;;  %p417_p3 = scmp.lt.s32.totalorder %s410_s15, %s748_s2 }
  0x34   : > { %p412_p1 = scmp.ne.s32.totalorder %s410_s15, %s411_s18  ;;  %p418_p4 = scmp.lt.s32.totalorder %s416_s27, %s411_s18 }
  0x36   : > { %p414_p10 = pnand %p413_p2, %p412_p1  ;;  %p419_p7 = por %p418_p4, %p417_p3 }
  0x38   : > { %p415_p0 = pneg %p414_p10 }
  0x3a   : > { %p420_p8 = pnand %p419_p7, %p415_p0 }
  0x3c   : > { %423 = shalt.err (!%p420_p8)
}
  0x3d   : > { %304 = dma.hbm_to_vmem [thread:$0]  (!%p667_p6), %s139_s13, 32, %s141_s5, %s125_s28  }
  0x3e   : > { %149 = sbr.rel (%p674_p9) target bundleno = 84 (0x54), region = 24  ;;  %s151_s16 = sand.u32 (!%p674_p9), 1, %s531_s22  }
  0x3f   : > { %s287_s6 = sshll.u32 (!%p674_p9), %s151_s16, 1  ;;  %s152_s7 = scalar_lea.sflag (!%p674_p9), [#allocation6], %s151_s16 }
  0x40   : > { %s155_s9 = scalar_lea.vmem (!%p674_p9), [#allocation5], %s287_s6 }
  0x43   : > { %506 = dma.done.wait (%p635_p5), %s152_s7, 32  }
  0x44   : > { %508 = vsyncadd (%p635_p5), %s152_s7, 4294967264  ;;  %s172_s15 = sand.u32 1, %s519_s0   ;;  %s290_s17 = sshll.u32 %s539_s24, 1  ;;  %v179_v0 = vld [vmem:[%s155_s9] sm:$0x3] }
  0x45   : > { %s178_s28 = sld [smem:[#allocation3 + %s539_s24]]  ;;  %s288_s5 = sshll.u32 %s172_s15, 1 }
  0x46   : > { %s195_s13 = scalar_lea.hbm %s749_s3, %s290_s17  ;;  %s174_s18 = scalar_lea.vmem [#allocation8], %s288_s5 }
  0x47   : > { %s197_s19 = sshll.u32 %s174_s18, 4  ;;  %s199_s1 = sshll.u32 %s195_s13, 4  ;;  %s198_s19 = int_to_ptr.vmem [resolvable:$true] %s197_s19  ;;  %s200_s1 = int_to_ptr.hbm [resolvable:$true] %s199_s1 }
  0x48   : > { %s184_s8 = scalar_lea.sflag [#allocation7], %s172_s15  ;;  %s453_s27 = sshra.s32 %s200_s1, 4  ;;  %s454_s27 = int_to_ptr.hbm [resolvable:$true] %s453_s27 }
  0x49   : > { %s455_s30 = scalar_lea.hbm %s454_s27, 2  ;;  %s459_s16 = scalar_lea.hbm %s749_s3, 4 }
  0x4a   : > { %p456_p5 = scmp.ne.s32.totalorder %s454_s27, %s455_s30  ;;  %p460_p1 = scmp.lt.s32.totalorder %s454_s27, %s749_s3 }
  0x4b   : > { %v180_v1 = vstv %s178_s28  ;;  %p461_p2 = scmp.lt.s32.totalorder %s459_s16, %s455_s30 }
  0x4c   : > { %v181_v2 = vmul.f32 %v180_v1, %v179_v0  ;;  %p457_p6 = pnand %p456_p5, %p648_p11 }
  0x4d   : > { %p462_p10 = por %p461_p2, %p460_p1 }
  0x4e   : > { %182 = vst [vmem:[%s174_s18] sm:$0x3] %v181_v2  ;;  %p458_p9 = pneg %p457_p6 }
  0x50   : > { %p463_p0 = pnand %p462_p10, %p458_p9 }
  0x52   : > { %466 = shalt.err (!%p463_p0)
}
  0x53   : > { %297 = dma.vmem_to_hbm [thread:$0]  (%p648_p11), %s198_s19, 32, %s200_s1, %s184_s8  }
  0x54 PF: > { %s211_s9 = sand.u32 1, %s515_s20   ;;  %p306_p3 = pnand %p283_p12, %p653_p13 }
  0x55   : > { %s212_s15 = scalar_lea.sflag [#allocation7], %s211_s9 }
  0x56   : > { %p307_p4 = pneg %p306_p3 }
  0x58   : > { %510 = dma.done.wait (%p307_p4), %s212_s15, 32  }
  0x59   : > { %512 = vsyncadd (%p307_p4), %s212_s15, 4294967264  ;;  %s32_s26 = sadd.s32 1, %s547_s26   ;;  %s759_s12 = sld [smem:[#allocation15_spill]] }
  0x5a   : > { %p29_p7 = scmp.ge.s32.totalorder %s32_s26, 4   ;;  %s760_s17 = sld [smem:[#allocation14_spill]] }
  0x5b   : > { %s761_s20 = smov %s519_s0  ;;  %s762_s0 = smov %s523_s21 }
  0x5c   : > { %s763_s21 = smov %s643_s10  ;;  %s764_s1 = smov %s531_s22 }
  0x5d   : > { %s765_s22 = smov %s535_s23  ;;  %s767_s24 = smov %s543_s25 }
  0x5e   :  { %31 = sbr.rel (!%p29_p7) target bundleno = 15 (0xf), region = 69 }
  0x5f   : > { %s766_s23 = smov %s759_s12 }
  0x60   : > { %s768_s25 = smov %s760_s17 }
  0x63   :  { %218 = vsyncpa [#allocation6], 1 }
  0x64   :  { %220 = vsyncpa [#allocation6 + $0x1], 1 }
  0x65   :  { %221 = vsyncpa [#allocation7], 1 }
  0x66   :  { %223 = vsyncpa [#allocation7 + $0x1], 1 }

</bundles_post_ra>
